<compile_context>
chip_gen: v7x
topology: tpu7x:2x2x1
jax: 0.10.0
libtpu: 0.0.40
codegen_flags: <defaults>
</compile_context>

<pallas_src>
import jax
import jax.numpy as jnp
from jax.experimental import pallas as pl
from jax.experimental.pallas import tpu as pltpu

NUM_CAMS = 8  # len(self.res_fcs) in the PyTorch module


def _round_up(n, m):
    return ((n + m - 1) // m) * m


def cam_embedding_kernel(tile_cam_ref, n_tiles_ref, x_ref, w_ref, b_ref, o_ref):
    # tile_cam_ref: SMEM (tiles_alloc,) int32 -- camera id of row tile t
    #               (slack tiles repeat the last real camera -> no extra DMA).
    # n_tiles_ref:  SMEM (1,) int32 -- number of real (non-slack) row tiles.
    # x_ref: (tm, D) f32        camera-grouped input row tile
    # w_ref: (1, D, D) bf16     weight of camera tile_cam[t]
    # b_ref: (NUM_CAMS, D) f32  full bias table, VMEM-resident
    # o_ref: (tm, D) f32        output row tile (written exactly once)
    t = pl.program_id(0)
    n_real = n_tiles_ref[0]

    @pl.when(t < n_real)
    def _():
        c = tile_cam_ref[t]
        x = x_ref[...]                                       # (tm, D) f32
        w = w_ref[0]                                         # (D, D) bf16
        y = jnp.dot(x.astype(w.dtype), w,
                    preferred_element_type=jnp.float32)      # MXU, f32 accum
        b = b_ref[pl.ds(c, 1), :]                            # (1, D) bias row
        y = jnp.maximum(y + b, 0.0)                          # bias + ReLU, f32
        o_ref[...] = (x + y).astype(o_ref.dtype)             # residual add

    @pl.when(t >= n_real)
    def _():
        # Slack tiles of the static grid bound: their rows are never read
        # back; write zeros so the output buffer stays deterministic.
        o_ref[...] = jnp.zeros_like(o_ref)


def cam_embedding(x, cam_pred_ids, weights, biases, *, block_rows=None,
                  compute_dtype=jnp.bfloat16):
    """x: (B, D) f32, cam_pred_ids: (B,) int,
    weights: (NUM_CAMS, D_in, D_out) f32 (pre-transposed), biases: (NUM_CAMS, D)."""
    B, D = x.shape
    num_cams = weights.shape[0]
    w_itemsize = jnp.dtype(compute_dtype).itemsize

    # ---- generation-aware VMEM budget & row-tile size ----------------------
    try:
        phys_vmem = int(pltpu.get_tpu_info().vmem_capacity_bytes)
    except Exception:
        phys_vmem = 64 * 2**20                       # conservative (v7x per-TC)
    vmem_cap = (phys_vmem * 3) // 4                  # leave compiler headroom

    if block_rows is None:
        # weight-stream roofline crossover: ~240 rows v5e, ~310 v7x, ~680 v6e
        block_rows = 512 if phys_vmem <= 64 * 2**20 else 768
    # Don't over-tile small batches: padding is per camera group (<= num_cams*tm rows).
    tm = min(block_rows, _round_up(max(-(-B // num_cams), 1), 8))
    tm = max(8, (tm // 8) * 8)

    def vmem_need(t):   # x/out tiles (f32, double-buffered) + weight (bf16, x2) + bias
        return 2 * (2 * t * D * 4 + D * D * w_itemsize) + 2 * num_cams * D * 4
    while tm > 8 and vmem_need(tm) > vmem_cap:
        tm = max(8, (tm // 2 // 8) * 8)

    # static upper bound on the number of real row tiles: sum_c ceil(count_c/tm)
    tiles_alloc = -(-B // tm) + num_cams - 1
    B_alloc = tiles_alloc * tm

    # ---- group rows by camera; pad every group to a multiple of tm ---------
    cams = jnp.clip(cam_pred_ids.astype(jnp.int32), 0, num_cams - 1)
    order = jnp.argsort(cams)                                     # (B,)
    inv = jnp.zeros((B,), jnp.int32).at[order].set(
        jnp.arange(B, dtype=jnp.int32))                           # scatter, no 2nd sort
    cs = cams[order]

    counts = jnp.bincount(cs, length=num_cams)                    # rows per camera
    group_offs = jnp.concatenate(
        [jnp.zeros((1,), counts.dtype), jnp.cumsum(counts)])
    tiles_per_cam = (counts + tm - 1) // tm
    cum_tiles = jnp.cumsum(tiles_per_cam)
    n_real_tiles = jnp.maximum(cum_tiles[-1], 1).astype(jnp.int32)
    aligned_start = jnp.concatenate(
        [jnp.zeros((1,), cum_tiles.dtype), cum_tiles[:-1]]) * tm  # row offset per cam

    # destination slot of every sorted row in the group-aligned layout
    ar = jnp.arange(B, dtype=jnp.int32)
    dest = (aligned_start[cs] + (ar - group_offs[cs])).astype(jnp.int32)
    # source row for every aligned slot (padding slots read row 0; never read back)
    src = jnp.zeros((B_alloc,), jnp.int32).at[dest].set(order.astype(jnp.int32))
    xs = x[src]                                                   # (B_alloc, D)

    # camera id per row tile; slack tiles repeat the last real camera so the
    # weight block index never changes across them
    t_ids = jnp.arange(tiles_alloc, dtype=jnp.int32)
    tile_cam = jnp.searchsorted(cum_tiles, t_ids, side='right').astype(jnp.int32)
    tile_cam = jnp.minimum(tile_cam, num_cams - 1)
    last_real_cam = tile_cam[n_real_tiles - 1]
    tile_cam = jnp.where(t_ids < n_real_tiles, tile_cam, last_real_cam)
    n_tiles_arr = n_real_tiles.reshape(1)

    # ---- operand prep -------------------------------------------------------
    w_c = weights.astype(compute_dtype)          # bf16 halves weight HBM/VMEM traffic
    b2 = biases.astype(jnp.float32)

    vmem_limit = int(min(max(vmem_need(tm) * 3 // 2, 16 * 2**20), vmem_cap))

    out_aligned = pl.pallas_call(
        cam_embedding_kernel,
        out_shape=jax.ShapeDtypeStruct((B_alloc, D), x.dtype),
        grid_spec=pltpu.PrefetchScalarGridSpec(
            num_scalar_prefetch=2,                 # tile_cam, n_real_tiles
            grid=(tiles_alloc,),
            in_specs=[
                # camera-grouped input row tile
                pl.BlockSpec((tm, D), lambda t, tc, nt: (t, 0)),
                # weight of this tile's camera; tiles are sorted by camera so
                # each camera's weight is DMA'd at most once (repeat index = skip)
                pl.BlockSpec((1, D, D), lambda t, tc, nt: (tc[t], 0, 0)),
                # full bias table, resident in VMEM (constant block index)
                pl.BlockSpec((num_cams, D), lambda t, tc, nt: (0, 0)),
            ],
            out_specs=pl.BlockSpec((tm, D), lambda t, tc, nt: (t, 0)),
        ),
        compiler_params=pltpu.CompilerParams(
            dimension_semantics=("parallel",),     # row tiles split across TCs on v7x
            vmem_limit_bytes=vmem_limit),
        cost_estimate=pl.CostEstimate(
            flops=2 * B_alloc * D * D,
            transcendentals=0,
            bytes_accessed=(2 * B_alloc * D * 4               # x in + out
                            + num_cams * D * D * w_itemsize   # each weight once
                            + num_cams * D * 4)),             # bias table
    )(tile_cam, n_tiles_arr, xs, w_c, b2)

    # gather the real rows back into the original order
    return out_aligned[dest[inv]]


def reference(x, cam_pred_ids, weights, biases, compute_dtype=jnp.bfloat16):
    w = weights[cam_pred_ids].astype(compute_dtype)             # (B, D, D)
    y = jnp.einsum('bd,bde->be', x.astype(compute_dtype), w,
                   preferred_element_type=jnp.float32)
    y = jnp.maximum(y + biases[cam_pred_ids], 0.0)
    return x + y


if __name__ == "__main__":
    # Small shapes consistent with the module (original D=2048 -> use D=256).
    D = 256
    key = jax.random.PRNGKey(0)
    kw, kb, kx1, kc1, kx2, kc2, kx3, kc3 = jax.random.split(key, 8)

    bound = 1.0 / float(D) ** 0.5
    weights = jax.random.uniform(kw, (NUM_CAMS, D, D), jnp.float32,
                                 minval=-bound, maxval=bound)
    biases = jax.random.uniform(kb, (NUM_CAMS, D), jnp.float32,
                                minval=-bound, maxval=bound)

    # Case 1: batch of 8, every camera potentially present.
    B1 = 8
    x1 = jax.random.normal(kx1, (B1, D), dtype=jnp.float32)
    c1 = jax.random.randint(kc1, (B1,), 0, NUM_CAMS, dtype=jnp.int32)
    out1 = jax.block_until_ready(cam_embedding(x1, c1, weights, biases))
    assert out1.shape == (B1, D)
    assert jnp.allclose(out1, reference(x1, c1, weights, biases),
                        atol=2e-3, rtol=2e-3), "case 1 mismatch"

    # Case 2: ragged batch (13) with tiny row tiles so several cameras each
    # get their own padded tile and the slack-tile path is exercised.
    B2 = 13
    x2 = jax.random.normal(kx2, (B2, D), dtype=jnp.float32)
    c2 = jax.random.randint(kc2, (B2,), 0, NUM_CAMS, dtype=jnp.int32)
    out2 = jax.block_until_ready(
        cam_embedding(x2, c2, weights, biases, block_rows=8))
    assert out2.shape == (B2, D)
    assert jnp.allclose(out2, reference(x2, c2, weights, biases),
                        atol=2e-3, rtol=2e-3), "case 2 mismatch"

    # Case 3: larger batch with the automatic tile size (multi-tile camera groups).
    B3 = 96
    x3 = jax.random.normal(kx3, (B3, D), dtype=jnp.float32)
    c3 = jax.random.randint(kc3, (B3,), 0, NUM_CAMS, dtype=jnp.int32)
    out3 = jax.block_until_ready(cam_embedding(x3, c3, weights, biases))
    assert out3.shape == (B3, D)
    assert jnp.allclose(out3, reference(x3, c3, weights, biases),
                        atol=2e-3, rtol=2e-3), "case 3 mismatch"

    print("KERNEL_OK")
</pallas_src>

<mosaic_0001>
module attributes {stable_mosaic.version = 11 : i64} {
  func.func @cam_embedding_kernel(%arg0: i32, %arg1: memref<8xi32, #tpu.memory_space<smem>>, %arg2: memref<1xi32, #tpu.memory_space<smem>>, %arg3: memref<8x256xf32, #tpu.memory_space<vmem>>, %arg4: memref<1x256x256xbf16, #tpu.memory_space<vmem>>, %arg5: memref<8x256xf32, #tpu.memory_space<vmem>>, %arg6: memref<8x256xf32, #tpu.memory_space<vmem>>) attributes {dimension_semantics = [#tpu.dimension_semantics<parallel>], iteration_bounds = array<i64: 8>, scalar_prefetch = 2 : i64, scratch_operands = 0 : i64, tpu.core_type = #tpu.core_type<tc>, window_params = [{transform_indices = @transform_0, window_bounds = array<i64: 8, 256>}, {transform_indices = @transform_1, window_bounds = array<i64: 1, 256, 256>}, {pipeline_mode = #tpu.pipeline_mode<synchronous>, transform_indices = @transform_2, window_bounds = array<i64: 8, 256>}, {transform_indices = @transform_3, window_bounds = array<i64: 8, 256>}]} {
    %c0 = arith.constant 0 : index
    %0 = memref.load %arg2[%c0] : memref<1xi32, #tpu.memory_space<smem>>
    %1 = arith.cmpi slt, %arg0, %0 : i32
    %2 = arith.extui %1 : i1 to i32
    %c0_i32 = arith.constant 0 : i32
    %3 = arith.cmpi ne, %2, %c0_i32 : i32
    scf.if %3 {
      %7 = arith.index_cast %arg0 : i32 to index
      %8 = memref.load %arg1[%7] : memref<8xi32, #tpu.memory_space<smem>>
      %c0_1 = arith.constant 0 : index
      %c0_2 = arith.constant 0 : index
      %9 = vector.load %arg3[%c0_1, %c0_2] : memref<8x256xf32, #tpu.memory_space<vmem>>, vector<8x256xf32>
      %c0_3 = arith.constant 0 : index
      %c0_4 = arith.constant 0 : index
      %c0_5 = arith.constant 0 : index
      %10 = vector.load %arg4[%c0_3, %c0_4, %c0_5] : memref<1x256x256xbf16, #tpu.memory_space<vmem>>, vector<1x256x256xbf16>
      %11 = vector.shape_cast %10 : vector<1x256x256xbf16> to vector<256x256xbf16>
      %12 = arith.truncf %9 : vector<8x256xf32> to vector<8x256xbf16>
      %cst = arith.constant dense<0.000000e+00> : vector<8x256xf32>
      %13 = tpu.matmul %12, %11, %cst {dimension_numbers = #tpu.dot_dimension_numbers<[1], [0], [0], [1], [0, 0, 1, 1], [], []>} : vector<8x256xbf16>, vector<256x256xbf16>, vector<8x256xf32> -> vector<8x256xf32>
      %14 = arith.index_cast %8 : i32 to index
      %c0_6 = arith.constant 0 : index
      %15 = vector.load %arg5[%14, %c0_6] : memref<8x256xf32, #tpu.memory_space<vmem>>, vector<1x256xf32>
      %16 = vector.broadcast %15 : vector<1x256xf32> to vector<8x256xf32>
      %17 = arith.addf %13, %16 : vector<8x256xf32>
      %cst_7 = arith.constant 0.000000e+00 : f32
      %18 = vector.broadcast %cst_7 : f32 to vector<8x256xf32>
      %19 = arith.maximumf %17, %18 : vector<8x256xf32>
      %20 = arith.addf %9, %19 : vector<8x256xf32>
      %c0_8 = arith.constant 0 : index
      %c0_9 = arith.constant 0 : index
      %21 = vector.load %arg6[%c0_8, %c0_9] : memref<8x256xf32, #tpu.memory_space<vmem>>, vector<8x256xf32>
      tpu.vector_store %arg6[%c0_8, %c0_9], %20 {strides = array<i32>} : memref<8x256xf32, #tpu.memory_space<vmem>>, vector<8x256xf32>,
    } else {
    }
    %4 = arith.cmpi sge, %arg0, %0 : i32
    %5 = arith.extui %4 : i1 to i32
    %c0_i32_0 = arith.constant 0 : i32
    %6 = arith.cmpi ne, %5, %c0_i32_0 : i32
    scf.if %6 {
      %cst = arith.constant 0.000000e+00 : f32
      %7 = vector.broadcast %cst : f32 to vector<8x256xf32>
      %c0_1 = arith.constant 0 : index
      %c0_2 = arith.constant 0 : index
      %8 = vector.load %arg6[%c0_1, %c0_2] : memref<8x256xf32, #tpu.memory_space<vmem>>, vector<8x256xf32>
      tpu.vector_store %arg6[%c0_1, %c0_2], %7 {strides = array<i32>} : memref<8x256xf32, #tpu.memory_space<vmem>>, vector<8x256xf32>,
    } else {
    }
    return
  }
  func.func @transform_0(%arg0: i32, %arg1: memref<8xi32, #tpu.memory_space<smem>>, %arg2: memref<1xi32, #tpu.memory_space<smem>>) -> (i32, i32) {
    %c0_i32 = arith.constant 0 : i32
    %c0_i32_0 = arith.constant 0 : i32
    return %arg0, %c0_i32 : i32, i32
  }
  func.func @transform_1(%arg0: i32, %arg1: memref<8xi32, #tpu.memory_space<smem>>, %arg2: memref<1xi32, #tpu.memory_space<smem>>) -> (i32, i32, i32) {
    %0 = arith.index_cast %arg0 : i32 to index
    %1 = memref.load %arg1[%0] : memref<8xi32, #tpu.memory_space<smem>>
    %c0_i32 = arith.constant 0 : i32
    %c0_i32_0 = arith.constant 0 : i32
    %c0_i32_1 = arith.constant 0 : i32
    return %1, %c0_i32, %c0_i32_0 : i32, i32, i32
  }
  func.func @transform_2(%arg0: i32, %arg1: memref<8xi32, #tpu.memory_space<smem>>, %arg2: memref<1xi32, #tpu.memory_space<smem>>) -> (i32, i32) {
    %c0_i32 = arith.constant 0 : i32
    %c0_i32_0 = arith.constant 0 : i32
    %c0_i32_1 = arith.constant 0 : i32
    return %c0_i32, %c0_i32_0 : i32, i32
  }
  func.func @transform_3(%arg0: i32, %arg1: memref<8xi32, #tpu.memory_space<smem>>, %arg2: memref<1xi32, #tpu.memory_space<smem>>) -> (i32, i32) {
    %c0_i32 = arith.constant 0 : i32
    %c0_i32_0 = arith.constant 0 : i32
    return %arg0, %c0_i32 : i32, i32
  }
}

</mosaic_0001>

<bundles_post_ra>
// kernel: tpu_custom_call.1
= control target key start
LH: loop header
LB: loop body
LE: loop exit
PB: predicated region body
PF: predicated region fallthrough
CT: control target
= control target key end

     0   :  { %s1451_s0 = inlined_call_operand.vmem [shape: s32[8], index: 0, kind: input, shape index: {}]   ;;  %s1452_s1 = inlined_call_operand.<no memory space> [shape: s32[1], index: 1, kind: input, shape index: {}]   ;;  %s1453_s2 = inlined_call_operand.hbm [shape: f32[64,256], index: 2, kind: input, shape index: {}]   ;;  %s1454_s3 = inlined_call_operand.hbm [shape: bf16[8,256,256], index: 3, kind: input, shape index: {}]   ;;  %s1455_s4 = inlined_call_operand.hbm [shape: f32[8,256], index: 4, kind: input, shape index: {}]   ;;  %s1456_s5 = inlined_call_operand.hbm [shape: f32[64,256], index: 5, kind: output, shape index: {}]  }
   0x1   :  { %1464 = sst [smem:[#allocation20_spill]] %s1455_s4  ;;  %s10_s20 = sshll.u32 %s1451_s0, 4  ;;  %s11_s20 = int_to_ptr.vmem [resolvable:$true] %s10_s20 }
   0x2   :  { %14 = sst [smem:[#allocation4]] %s1452_s1  ;;  %s849_s23 = scalar_lea.vmem %s11_s20, 16 }
   0x3   :  { %p850_p0 = scmp.ne.s32.totalorder %s11_s20, %s849_s23  ;;  %p854_p1 = scmp.lt.s32.totalorder %s11_s20, %s11_s20 }
   0x4   :  { %p855_p2 = scmp.lt.s32.totalorder %s849_s23, %s849_s23 }
   0x6   :  { %p856_p3 = por %p855_p2, %p854_p1 }
   0x8   :  { %p857_p4 = pnand %p856_p3, %p850_p0 }
   0xa   :  { %860 = shalt.err (!%p857_p4)  }
   0xb   :  { %s1051_s24 = smov [#allocation3]  }
   0xc   :  { %13 = dma.vmem_to_smem %s11_s20, 16, %s1051_s24, [#allocation2] }
   0xd   :  { %1005 = dma.done.wait [#allocation2], 16 }
   0xe   :  { %1006 = vsyncadd [#allocation2], 4294967280 }
   0xf   :  { %16 = sfence }
  0x10   :  { %17 = vsyncpa [#allocation6], 0 }
  0x11   :  { %19 = vsyncpa [#allocation6 + $0x1], 0 }
  0x12   :  { %20 = vsyncpa [#allocation9], 0 }
  0x13   :  { %22 = vsyncpa [#allocation9 + $0x1], 0 }
  0x14   :  { %23 = vsyncpa [#allocation7], 0 }
  0x15   :  { %25 = vsyncpa [#allocation7 + $0x1], 0  ;;  %s1095_s0 = smov 0   ;;  %s1097_s1 = smov 0  }
  0x16   :  { %s1099_s25 = smov 0   ;;  %s1101_s26 = smov 0  }
  0x17   :  { %s1103_s27 = smov 0   ;;  %s1105_s28 = smov 0  }
  0x18   :  { %s1107_s29 = smov 0  }
  0x19 LB: > { %s1129_s30 = sadd.s32 4294967295, %s1049_s29   ;;  %s647_s6 = sadd.s32 4294967294, %s1049_s29   ;;  %s1049_s29 = sphi %s1107_s29, %s1499_s29   ;;  %s1045_s28 = sphi %s1105_s28, %s1498_s28   ;;  %s1041_s27 = sphi %s1103_s27, %s1497_s27   ;;  %s1037_s26 = sphi %s1101_s26, %s1496_s26   ;;  %s1033_s25 = sphi %s1099_s25, %s1495_s25   ;;  %s1029_s1 = sphi %s1097_s1, %s1494_s1   ;;  %s1025_s0 = sphi %s1095_s0, %s1493_s0  }
  0x1a   : > { %p51_p5 = scmp.ne.s32.totalorder %s1041_s27, %s1037_s26  ;;  %p1457_p6 = scmp.eq.s32.totalorder %s1129_s30, 0 }
  0x1b   : > { %p79_p9 = scmp.ne.s32.totalorder %s1029_s1, %s1025_s0  ;;  %p130_p11 = scmp.eq.s32.totalorder %s647_s6, 7 }
  0x1c   : > { %p1139_p8 = por %p1457_p6, %p51_p5  ;;  %p648_p13 = scmp.ge.s32.totalorder %s1049_s29, 1 }
  0x1d   : > { %p1147_p12 = por %p79_p9, %p1457_p6  ;;  %p1152_p0 = por %p130_p11, %p51_p5 }
  0x1e   : > { %s1465_s7 = scalar_select %p1139_p8, 1, 0 }
  0x1f   : > { %s1466_s8 = scalar_select %p1147_p12, 1, 0 }
  0x20   : > { %s1467_s9 = scalar_select %p1152_p0, 1, 0 }
  0x21   : > { %p137_p1 = scmp.lt.s32.totalorder %s1049_s29, 9  ;;  %s1052_s11 = smov [#allocation10]  }
  0x22   : > { %s150_s12 = sshll.u32 %s1052_s11, 4  ;;  %s1164_s13 = sadd.s32 1, %s1049_s29   ;;  %s151_s12 = int_to_ptr.vmem [resolvable:$true] %s150_s12 }
  0x23   : > { %p1157_p2 = pnand %p648_p13, %p137_p1  ;;  %s35_s15 = ssub.s32 %s1049_s29, %s1164_s13 }
  0x24   : > { %p1174_p5 = scmp.eq.s32.totalorder %s35_s15, 0  ;;  %s38_s17 = sadd.s32 1, %s1045_s28 }
  0x25   : > { %s1468_s10 = scalar_select %p1157_p2, 1, 0 }
  0x26   : > { %p719_p3 = pneg %p1157_p2  ;;  %s1471_s4 = sld [smem:[#allocation20_spill]] }
  0x27   : > { %s1470_s16 = scalar_select %p1174_p5, 1, 0 }
  0x28   : > { %p1168_p4 = pnand %p719_p3, %p1457_p6 }
  0x2a   : > { %p863_p13 = pneg %p1168_p4 }
  0x2c   : > { %s861_s20 = scalar_lea.hbm %s1471_s4, 256 }
  0x2d   : > { %p862_p11 = scmp.ne.s32.totalorder %s1471_s4, %s861_s20  ;;  %p868_p6 = scmp.lt.u32.totalorder %s861_s20, %s1471_s4 }
  0x2f   : > { %p864_p1 = pnand %p863_p13, %p862_p11 }
  0x31   : > { %p865_p3 = pneg %p864_p1 }
  0x33   : > { %p870_p7 = pnand %p868_p6, %p865_p3 }
  0x35   : > { %873 = shalt.err (!%p870_p7)
}
  0x36   : > { %s874_s0 = scalar_lea.vmem %s151_s12, 256  ;;  %p882_p12 = scmp.lt.s32.totalorder %s151_s12, %s151_s12 }
  0x37   : > { %p875_p10 = scmp.ne.s32.totalorder %s151_s12, %s874_s0  ;;  %p883_p8 = scmp.lt.s32.totalorder %s874_s0, %s874_s0 }
  0x39   : > { %p877_p9 = pnand %p875_p10, %p863_p13  ;;  %p884_p2 = por %p883_p8, %p882_p12 }
  0x3b   : > { %p878_p0 = pneg %p877_p9 }
  0x3d   : > { %p885_p5 = pnand %p884_p2, %p878_p0 }
  0x3f   : > { %888 = shalt.err (!%p885_p5)
}
  0x40   : > { %722 = dma.hbm_to_vmem [thread:$0]  (!%p1168_p4), %s1471_s4, 256, %s151_s12, [#allocation9]  }
  0x41   : > { %p1472_p6 = scmp.ne.s32.totalorder %s1470_s16, 0  ;;  %p46_p7 = scmp.eq.s32.totalorder %s1049_s29, 0 }
  0x42   : > { %s61_s15 = sld [smem:[#allocation3 + %s1049_s29]]  ;;  %p1474_p8 = scmp.ne.s32.totalorder %s1045_s28, %s1041_s27 }
  0x43   : > { %s1200_s14 = scalar_select %p1472_p6, %s1045_s28, %s38_s17  }
  0x44   : > { %s62_s18 = sld [smem:[#allocation3 + %s1164_s13]]  ;;  %p1475_p10 = scmp.eq.s32.totalorder %s1129_s30, 7 }
  0x45   : > { %1473 = sst [smem:[#allocation19_spill]] %s1200_s14  ;;  %s66_s20 = sadd.s32 1, %s1033_s25 }
  0x46   : > { %p1210_p12 = por %p1475_p10, %p1474_p8  ;;  %p1477_p0 = pmov %p1474_p8 }
  0x47   : > { %p1478_p5 = scmp.ne.s32.totalorder %s1033_s25, %s1029_s1  ;;  %s161_s16 = sand.u32 1, %s1045_s28  }
  0x48   : > { %s1476_s19 = scalar_select %p1210_p12, 1, 0 }
  0x49   : > { %p47_p2 = por %p46_p7, %p1477_p0  ;;  %p1221_p4 = por %p1478_p5, %p46_p7 }
  0x4a   : > { %p1461_p9 = scmp.lt.s32.totalorder %s1049_s29, 8  ;;  %s651_s17 = sshll.u32 %s161_s16, 4 }
  0x4b   : > { %s703_s21 = sshll.u32 %s1049_s29, 8  ;;  %s165_s22 = scalar_lea.vmem [#allocation5], %s651_s17 }
  0x4c   : > { %s173_s23 = sshll.u32 %s165_s22, 4  ;;  %s63_s24 = ssub.s32 %s61_s15, %s62_s18  ;;  %s1239_s23 = int_to_ptr.vmem [resolvable:$true] %s173_s23 }
  0x4d   : > { %s1231_s11 = scalar_lea.hbm %s1453_s2, %s703_s21  ;;  %p64_p11 = scmp.eq.s32.totalorder %s63_s24, 0 }
  0x4e   : > { %p1235_p13 = pnand %p1461_p9, %p47_p2  ;;  %p1245_p1 = pnand %p1461_p9, %p1221_p4 }
  0x4f   : > { %s1250_s18 = scalar_select %p64_p11, %s1033_s25, %s66_s20  }
  0x50   : > { %s1481_s15 = scalar_select %p1245_p1, 1, 0 }
  0x51   : > { %s162_s17 = scalar_lea.sflag [#allocation6], %s161_s16  ;;  %s889_s21 = scalar_lea.hbm %s1231_s11, 256 }
  0x52   : > { %p890_p3 = scmp.ne.s32.totalorder %s1231_s11, %s889_s21  ;;  %p891_p6 = pneg %p1235_p13 }
  0x53   : > { %s894_s0 = scalar_lea.hbm %s1453_s2, 2048  ;;  %p895_p10 = scmp.lt.u32.totalorder %s1231_s11, %s1453_s2 }
  0x54   : > { %p892_p7 = pnand %p891_p6, %p890_p3  ;;  %p896_p0 = scmp.lt.u32.totalorder %s894_s0, %s889_s21 }
  0x55   : > { %p898_p5 = scmp.lt.u32.totalorder %s889_s21, %s1231_s11 }
  0x56   : > { %p893_p8 = pneg %p892_p7  ;;  %p897_p2 = por %p896_p0, %p895_p10 }
  0x58   : > { %p899_p11 = por %p898_p5, %p897_p2 }
  0x5a   : > { %p900_p9 = pnand %p899_p11, %p893_p8 }
  0x5c   : > { %903 = shalt.err (!%p900_p9)
}
  0x5d   : > { %s904_s20 = scalar_lea.vmem %s1239_s23, 256  ;;  %s1053_s16 = smov [#allocation5]  }
  0x5e   : > { %p905_p3 = scmp.ne.s32.totalorder %s1239_s23, %s904_s20  ;;  %s909_s22 = sshll.u32 %s1053_s16, 4  ;;  %s910_s22 = int_to_ptr.vmem [resolvable:$false] %s909_s22 }
  0x5f   : > { %s911_s14 = scalar_lea.vmem %s910_s22, 512  ;;  %p912_p1 = scmp.lt.s32.totalorder %s1239_s23, %s910_s22 }
  0x60   : > { %p907_p7 = pnand %p905_p3, %p891_p6  ;;  %p913_p10 = scmp.lt.s32.totalorder %s911_s14, %s904_s20 }
  0x62   : > { %p908_p12 = pneg %p907_p7  ;;  %p914_p0 = por %p913_p10, %p912_p1 }
  0x64   : > { %p915_p2 = pnand %p914_p0, %p908_p12 }
  0x66   : > { %918 = shalt.err (!%p915_p2)
}
  0x67   : > { %726 = dma.hbm_to_vmem [thread:$0]  (!%p1235_p13), %s1231_s11, 256, %s1239_s23, %s162_s17  }
  0x68   : > { %s182_s21 = sand.u32 1, %s1033_s25   ;;  %p1482_p12 = scmp.lt.s32.totalorder %s1049_s29, 8 }
  0x69   : > { %s654_s24 = sshll.u32 %s182_s21, 8  ;;  %s180_s20 = sand.u32 1, %s1049_s29  }
  0x6a   : > { %s710_s0 = scalar_select %p1221_p4, [#allocation3], [#allocation12] }
  0x6b   : > { %s711_s6 = scalar_select %p1221_p4, %s1049_s29, 0 }
  0x6c   : > { %s1501_s0 = smov (!%p1482_p12, %s710_s0), [#allocation13]  ;;  %p1483_p9 = pmov %p1482_p12 }
  0x6d   : > { %s184_s16 = scalar_lea.vmem [#allocation8], %s654_s24  ;;  %s1295_s12 = scalar_lea.sflag [#allocation9], %s180_s20 }
  0x6e   : > { %s1503_s6 = smov (!%p1483_p9, %s711_s6), 0  ;;  %s192_s22 = sshll.u32 %s184_s16, 4  ;;  %s1288_s22 = int_to_ptr.vmem [resolvable:$true] %s192_s22 }
  0x6f   : > { %s185_s4 = sld [smem:[%s1501_s0 + %s1503_s6]]  ;;  %p1484_p13 = scmp.ne.s32.totalorder %s1481_s15, 0 }
  0x70   : > { %s924_s6 = scalar_lea.hbm %s1454_s3, 32768 }
  0x71   : > { %p921_p1 = pneg %p1484_p13 }
  0x75   : > { %s704_s14 = sshll.u32 %s185_s4, 12 }
  0x76   : > { %s1293_s17 = scalar_lea.hbm %s1454_s3, %s704_s14 }
  0x77   : > { %s919_s21 = scalar_lea.hbm %s1293_s17, 4096  ;;  %p925_p5 = scmp.lt.u32.totalorder %s1293_s17, %s1454_s3 }
  0x78   : > { %p920_p4 = scmp.ne.s32.totalorder %s1293_s17, %s919_s21  ;;  %p926_p11 = scmp.lt.u32.totalorder %s924_s6, %s919_s21 }
  0x79   : > { %p928_p7 = scmp.lt.u32.totalorder %s919_s21, %s1293_s17 }
  0x7a   : > { %p922_p6 = pnand %p921_p1, %p920_p4  ;;  %p927_p3 = por %p926_p11, %p925_p5 }
  0x7c   : > { %p923_p8 = pneg %p922_p6  ;;  %p929_p10 = por %p928_p7, %p927_p3 }
  0x7e   : > { %p930_p0 = pnand %p929_p10, %p923_p8 }
  0x80   : > { %933 = shalt.err (!%p930_p0)
}
  0x81   : > { %s934_s20 = scalar_lea.vmem %s1288_s22, 4096  ;;  %s1054_s14 = smov [#allocation8]  }
  0x82   : > { %p935_p2 = scmp.ne.s32.totalorder %s1288_s22, %s934_s20  ;;  %s939_s23 = sshll.u32 %s1054_s14, 4  ;;  %s940_s23 = int_to_ptr.vmem [resolvable:$false] %s939_s23 }
  0x83   : > { %s941_s11 = scalar_lea.vmem %s940_s23, 8192  ;;  %p942_p4 = scmp.lt.s32.totalorder %s1288_s22, %s940_s23 }
  0x84   : > { %p937_p12 = pnand %p935_p2, %p921_p1  ;;  %p943_p6 = scmp.lt.s32.totalorder %s941_s11, %s934_s20 }
  0x86   : > { %p938_p9 = pneg %p937_p12  ;;  %p944_p5 = por %p943_p6, %p942_p4 }
  0x88   : > { %p945_p11 = pnand %p944_p5, %p938_p9 }
  0x8a   : > { %948 = shalt.err (!%p945_p11)
}
  0x8b   : > { %s1055_s21 = smov 128   ;;  %s1056_s24 = smov 8  }
  0x8c   : > { %731 = dma.hbm_to_vmem [thread:$0]  (!%p1484_p13), %s1293_s17, 4096, %s1288_s22, %s1295_s12, %s1055_s21, %s1055_s21, %s1056_s24  }
  0x8d   : > { %p1485_p1 = scmp.ne.s32.totalorder %s1468_s10, 0 }
  0x8e   : > { %s1326_s0 = sand.u32 (!%p1485_p1), 1, %s1041_s27   ;;  %p1486_p8 = scmp.ne.s32.totalorder (!%p1485_p1), %s1465_s7, 0 }
  0x8f   : > { %204 = sbr.rel (%p1485_p1) target bundleno = 485 (0x1e5), region = 32  ;;  %s658_s6 = sshll.u32 (!%p1485_p1), %s1326_s0, 4 }
  0x90   : > { %s207_s4 = scalar_lea.sflag (!%p1485_p1), [#allocation6], %s1326_s0  ;;  %s1330_s16 = scalar_lea.vmem (!%p1485_p1), [#allocation5], %s658_s6 }
  0x96   : > { %1008 = dma.done.wait (%p1486_p8), %s207_s4, 256  }
  0x97   : > { %1010 = vsyncadd (%p1486_p8), %s207_s4, 4294967040  ;;  %s215_s10 = sand.u32 1, %s1129_s30   ;;  %s217_s15 = sand.u32 1, %s1029_s1  }
  0x98   : > { %s659_s22 = sshll.u32 %s217_s15, 8  ;;  %s216_s17 = scalar_lea.sflag [#allocation9], %s215_s10 }
  0x99   : > { %s1338_s12 = scalar_lea.vmem [#allocation8], %s659_s22  ;;  %p1487_p13 = scmp.ne.s32.totalorder %s1466_s8, 0 }
  0x9b   : > { %1012 = dma.done.wait (%p1487_p13), %s216_s17, 4096  }
  0x9c   : > { %1014 = vsyncadd (%p1487_p13), %s216_s17, 4294963200  ;;  %p1488_p3 = scmp.eq.s32.totalorder %s1129_s30, 0 }
  0x9e   : > { %1016 = dma.done.wait (%p1488_p3), [#allocation9], 256   ;;  %p1489_p7 = pmov %p1488_p3 }
  0x9f   : > { %s1348_s7 = sld [smem:[#allocation4]]  ;;  %s1350_s20 = scalar_lea.vmem [#allocation11], %s658_s6 }
  0xa0   : > { %1018 = vsyncadd (%p1489_p7), [#allocation9], 4294967040 }
  0xa5   : > { %p662_p10 = scmp.ge.s32.totalorder %s1129_s30, %s1348_s7 }
  0xa6   : > { %v801_v0 = vld [vmem:[%s1338_s12 + $0x4] ss:$8 sps:$4 sm:$0xff] (!%p662_p10)   ;;  %v803_v1 = vld [vmem:[%s1338_s12] ss:$8 sps:$4 sm:$0xff] (!%p662_p10)   ;;  %v804_v2 = vld [vmem:[%s1338_s12 + $0x14] ss:$8 sps:$4 sm:$0xff] (!%p662_p10)   ;;  %v304_v36 = vlaneseq (!%p662_p10) }
  0xa7   : > { %256 = sbr.rel (%p662_p10) target bundleno = 451 (0x1c3), region = 48  ;;  %474 = vmatprep.subr.bf16.mxu0 (!%p662_p10), %v801_v0  ;;  %v806_v3 = vld [vmem:[%s1338_s12 + $0x10] ss:$8 sps:$4 sm:$0xff] (!%p662_p10)   ;;  %v807_v4 = vld [vmem:[%s1338_s12 + $0x24] ss:$8 sps:$4 sm:$0xff] (!%p662_p10)   ;;  %s257_s8 = sld [smem:[#allocation3 + %s1129_s30]] (!%p662_p10) }
  0xa8   : > { %475 = vmatpush1.bf16.msra.mxu0 (!%p662_p10), %v803_v1  ;;  %v809_v5 = vld [vmem:[%s1338_s12 + $0x20] ss:$8 sps:$4 sm:$0xff] (!%p662_p10)   ;;  %v810_v6 = vld [vmem:[%s1338_s12 + $0x34] ss:$8 sps:$4 sm:$0xff] (!%p662_p10)   ;;  %v812_v7 = vld [vmem:[%s1338_s12 + $0x30] ss:$8 sps:$4 sm:$0xff] (!%p662_p10)  }
  0xa9   : > { %476 = vmatprep.subr.bf16.mxu0 (!%p662_p10), %v804_v2  ;;  %v813_v8 = vld [vmem:[%s1338_s12 + $0x44] ss:$8 sps:$4 sm:$0xff] (!%p662_p10)   ;;  %v815_v9 = vld [vmem:[%s1338_s12 + $0x40] ss:$8 sps:$4 sm:$0xff] (!%p662_p10)   ;;  %v816_v10 = vld [vmem:[%s1338_s12 + $0x54] ss:$8 sps:$4 sm:$0xff] (!%p662_p10)  }
  0xaa   : > { %v818_v11 = vld [vmem:[%s1338_s12 + $0x50] ss:$8 sps:$4 sm:$0xff] (!%p662_p10)   ;;  %v819_v12 = vld [vmem:[%s1338_s12 + $0x64] ss:$8 sps:$4 sm:$0xff] (!%p662_p10)   ;;  %v821_v15 = vld [vmem:[%s1338_s12 + $0x60] ss:$8 sps:$4 sm:$0xff] (!%p662_p10)  }
  0xab   : > { %v1368_v13 = vld [vmem:[%s1330_s16 + $0x8] sm:$0xff] (!%p662_p10)  ;;  %v258_v34 = vld [vmem:[%s1330_s16] sm:$0xff] (!%p662_p10)  ;;  %v305_v37 = vshrl.u32 (!%p662_p10), %v304_v36, 7 }
  0xac   : > { %477 = vmatpush1.bf16.msra.mxu0 (!%p662_p10), %v806_v3  ;;  %v293_v14 = vpack.c.bf16 (!%p662_p10), %v1368_v13, %v1368_v13  ;;  %v822_v16 = vld [vmem:[%s1338_s12 + $0x74] ss:$8 sps:$4 sm:$0xff] (!%p662_p10)   ;;  %v824_v17 = vld [vmem:[%s1338_s12 + $0x70] ss:$8 sps:$4 sm:$0xff] (!%p662_p10)   ;;  %v825_v18 = vld [vmem:[%s1338_s12 + $0x84] ss:$8 sps:$4 sm:$0xff] (!%p662_p10)   ;;  %v292_v35 = vpack.c.bf16 (!%p662_p10), %v258_v34, %v258_v34 }
  0xad   : > { %478 = vmatprep.subr.bf16.mxu0 (!%p662_p10), %v807_v4  ;;  %v827_v19 = vld [vmem:[%s1338_s12 + $0x80] ss:$8 sps:$4 sm:$0xff] (!%p662_p10)   ;;  %v828_v20 = vld [vmem:[%s1338_s12 + $0x94] ss:$8 sps:$4 sm:$0xff] (!%p662_p10)   ;;  %v830_v21 = vld [vmem:[%s1338_s12 + $0x90] ss:$8 sps:$4 sm:$0xff] (!%p662_p10)  }
  0xae   : > { %506 = vmatprep.mubr.bf16.mxu0 %v293_v14  ;;  %v831_v22 = vld [vmem:[%s1338_s12 + $0xa4] ss:$8 sps:$4 sm:$0xff]   ;;  %v833_v23 = vld [vmem:[%s1338_s12 + $0xa0] ss:$8 sps:$4 sm:$0xff]   ;;  %v834_v24 = vld [vmem:[%s1338_s12 + $0xb4] ss:$8 sps:$4 sm:$0xff]  }
  0xaf   : > { %v836_v25 = vld [vmem:[%s1338_s12 + $0xb0] ss:$8 sps:$4 sm:$0xff]   ;;  %v837_v26 = vld [vmem:[%s1338_s12 + $0xc4] ss:$8 sps:$4 sm:$0xff]   ;;  %v839_v27 = vld [vmem:[%s1338_s12 + $0xc0] ss:$8 sps:$4 sm:$0xff]  }
  0xb0   : > { %479 = vmatpush1.bf16.msra.mxu0 %v809_v5  ;;  %v840_v28 = vld [vmem:[%s1338_s12 + $0xd4] ss:$8 sps:$4 sm:$0xff]   ;;  %v842_v29 = vld [vmem:[%s1338_s12 + $0xd0] ss:$8 sps:$4 sm:$0xff]   ;;  %v843_v30 = vld [vmem:[%s1338_s12 + $0xe4] ss:$8 sps:$4 sm:$0xff]  }
  0xb1   : > { %480 = vmatprep.subr.bf16.mxu0 %v810_v6  ;;  %v845_v31 = vld [vmem:[%s1338_s12 + $0xe0] ss:$8 sps:$4 sm:$0xff]   ;;  %v846_v32 = vld [vmem:[%s1338_s12 + $0xf4] ss:$8 sps:$4 sm:$0xff]   ;;  %v848_v33 = vld [vmem:[%s1338_s12 + $0xf0] ss:$8 sps:$4 sm:$0xff]  }
  0xb2   : > { %s294_s14 = sshra.s32 %s257_s8, 3  ;;  %s297_s23 = sand.u32 7, %s257_s8  ;;  %v306_v38 = vsub.s32 0, %v305_v37  ;;  %v310_v40 = vsub.s32 1, %v305_v37 }
  0xb3   : > { %s705_s11 = sshll.u32 %s294_s14, 4 }
  0xb4   : > { %481 = vmatpush1.bf16.msra.mxu0 %v812_v7  ;;  %s300_s21 = sadd.s32 %s705_s11, %s297_s23 }
  0xb5   : > { %482 = vmatprep.subr.bf16.mxu0 %v813_v8  ;;  %s301_s24 = scalar_lea.vmem [#allocation10], %s300_s21 }
  0xb6   : > { %v302_v39 = vld [vmem:[%s301_s24] ss:$8 sm:$0x3] }
  0xb7   : > { %v307_v41 = vrot.slane %v302_v39, %v306_v38  ;;  %v311_v42 = vrot.slane %v302_v39, %v310_v40 }
  0xb8   : > { %483 = vmatpush1.bf16.msra.mxu0 %v815_v9 }
  0xb9   : > { %484 = vmatprep.subr.bf16.mxu0 %v816_v10 }
  0xbc   : > { %485 = vmatpush1.bf16.msra.mxu0 %v818_v11 }
  0xbd   : > { %486 = vmatprep.subr.bf16.mxu0 %v819_v12 }
  0xc0   : > { %487 = vmatpush1.bf16.msra.mxu0 %v821_v15 }
  0xc1   : > { %488 = vmatprep.subr.bf16.mxu0 %v822_v16 }
  0xc4   : > { %489 = vmatpush1.bf16.msra.mxu0 %v824_v17 }
  0xc5   : > { %490 = vmatprep.subr.bf16.mxu0 %v825_v18 }
  0xc8   : > { %491 = vmatpush1.bf16.msra.mxu0 %v827_v19 }
  0xc9   : > { %492 = vmatprep.subr.bf16.mxu0 %v828_v20 }
  0xcc   : > { %493 = vmatpush1.bf16.msra.mxu0 %v830_v21 }
  0xcd   : > { %494 = vmatprep.subr.bf16.mxu0 %v831_v22 }
  0xd0   : > { %495 = vmatpush1.bf16.msra.mxu0 %v833_v23 }
  0xd1   : > { %496 = vmatprep.subr.bf16.mxu0 %v834_v24 }
  0xd4   : > { %497 = vmatpush1.bf16.msra.mxu0 %v836_v25 }
  0xd5   : > { %498 = vmatprep.subr.bf16.mxu0 %v837_v26 }
  0xd8   : > { %499 = vmatpush1.bf16.msra.mxu0 %v839_v27 }
  0xd9   : > { %500 = vmatprep.subr.bf16.mxu0 %v840_v28 }
  0xdc   : > { %501 = vmatpush1.bf16.msra.mxu0 %v842_v29 }
  0xdd   : > { %502 = vmatprep.subr.bf16.mxu0 %v843_v30 }
  0xe0   : > { %503 = vmatpush1.bf16.msra.mxu0 %v845_v31 }
  0xe1   : > { %504 = vmatprep.subr.bf16.mxu0 %v846_v32 }
  0xe4   : > { %505 = vmatpush1.bf16.msra.mxu0 %v848_v33 }
  0xe7   : > { %507 = vmatmul.mubr.bf16.vlgmr.msra.gmra.mrb[0].mxu0 %v292_v35 }
 0x1ba   : > { %v508_v43 = vpop.f32.mrb[0].mxu0 }
 0x1bb   : > { %v509_v44 = vadd.f32 %v508_v43, %v307_v41  ;;  %v510_v45 = vpop.f32.mrb[1].mxu0 }
 0x1bc   : > { %v511_v46 = vadd.f32 %v510_v45, %v311_v42  ;;  %v512_v47 = vpop.f32.mrb[2].mxu0 }
 0x1bd   : > { %v515_v48 = vmax.f32 %v509_v44, 0.0  ;;  %v513_v49 = vpop.f32.mrb[3].mxu0 }
 0x1be   : > { %v516_v50 = vmax.f32 %v511_v46, 0.0 }
 0x1bf   : > { %v517_v51 = vadd.f32 %v515_v48, %v258_v34 }
 0x1c0   : > { %v518_v52 = vadd.f32 %v516_v50, %v1368_v13 }
 0x1c1   : > { %519 = vst [vmem:[%s1350_s20] sm:$0xff] %v517_v51 }
 0x1c2   : > { %520 = vst [vmem:[%s1350_s20 + $0x8] sm:$0xff] %v518_v52 }
 0x1c3 PF: > { %p697_p0 = scmp.lt.s32.totalorder %s1129_s30, %s1348_s7 }
 0x1c4   : > { %v1057_v53 = vmov (!%p697_p0), 0.0  }
 0x1c5   : > { %524 = sbr.rel (%p697_p0) target bundleno = 460 (0x1cc), region = 52  ;;  %525 = vst [vmem:[%s1350_s20] sm:$0xff] (!%p697_p0), %v1057_v53  ;;  %526 = vst [vmem:[%s1350_s20 + $0x8] sm:$0xff] (!%p697_p0), %v1057_v53 }
 0x1cc PF: > { %s706_s6 = sshll.u32 %s1129_s30, 8  ;;  %s542_s15 = sshll.u32 %s1350_s20, 4  ;;  %s543_s15 = int_to_ptr.vmem [resolvable:$true] %s542_s15 }
 0x1cd   : > { %s1404_s10 = scalar_lea.hbm %s1456_s5, %s706_s6  ;;  %s528_s22 = scalar_lea.sflag [#allocation7], %s1326_s0 }
 0x1ce   : > { %s949_s17 = scalar_lea.vmem %s543_s15, 256  ;;  %p1490_p12 = scmp.ne.s32.totalorder %s1476_s19, 0 }
 0x1cf   : > { %p950_p2 = scmp.ne.s32.totalorder %s543_s15, %s949_s17  ;;  %s1058_s12 = smov [#allocation11]  }
 0x1d0   : > { %s953_s7 = sshll.u32 %s1058_s12, 4  ;;  %s954_s7 = int_to_ptr.vmem [resolvable:$false] %s953_s7 }
 0x1d1   : > { %p951_p9 = pnand %p950_p2, %p1490_p12  ;;  %s955_s8 = scalar_lea.vmem %s954_s7, 512 }
 0x1d2   : > { %p956_p6 = scmp.lt.s32.totalorder %s543_s15, %s954_s7  ;;  %p957_p5 = scmp.lt.s32.totalorder %s955_s8, %s949_s17 }
 0x1d3   : > { %p952_p4 = pneg %p951_p9 }
 0x1d4   : > { %p958_p11 = por %p957_p5, %p956_p6 }
 0x1d6   : > { %p959_p1 = pnand %p958_p11, %p952_p4 }
 0x1d8   : > { %962 = shalt.err (!%p959_p1)
}
 0x1d9   : > { %s963_s30 = scalar_lea.hbm %s1404_s10, 256  ;;  %s967_s14 = scalar_lea.hbm %s1456_s5, 2048 }
 0x1da   : > { %p964_p8 = scmp.ne.s32.totalorder %s1404_s10, %s963_s30  ;;  %p968_p7 = scmp.lt.u32.totalorder %s1404_s10, %s1456_s5 }
 0x1db   : > { %p969_p10 = scmp.lt.u32.totalorder %s967_s14, %s963_s30  ;;  %p971_p2 = scmp.lt.u32.totalorder %s963_s30, %s1404_s10 }
 0x1dc   : > { %p965_p13 = pnand %p964_p8, %p1490_p12 }
 0x1dd   : > { %p970_p0 = por %p969_p10, %p968_p7 }
 0x1de   : > { %p966_p3 = pneg %p965_p13 }
 0x1df   : > { %p972_p9 = por %p971_p2, %p970_p0 }
 0x1e1   : > { %p973_p4 = pnand %p972_p9, %p966_p3 }
 0x1e3   : > { %976 = shalt.err (!%p973_p4)
}
 0x1e4   : > { %717 = dma.vmem_to_hbm [thread:$0]  (%p1490_p12), %s543_s15, 256, %s1404_s10, %s528_s22  }
 0x1e5 PF: > { %p739_p6 = scmp.ge.s32.totalorder %s1049_s29, 2  ;;  %s554_s21 = sand.u32 1, %s1037_s26  }
 0x1e6   : > { %p1491_p5 = scmp.ne.s32.totalorder %s1467_s9, 0  ;;  %s555_s24 = scalar_lea.sflag [#allocation7], %s554_s21 }
 0x1e8   : > { %p733_p11 = pnand %p739_p6, %p1491_p5 }
 0x1ea   : > { %1020 = dma.done.wait (!%p733_p11), %s555_s24, 256  }
 0x1eb   : > { %1022 = vsyncadd (!%p733_p11), %s555_s24, 4294967040  ;;  %s1492_s19 = sld [smem:[#allocation19_spill]]  ;;  %p28_p12 = scmp.ge.s32.totalorder %s1164_s13, 10  }
 0x1ec   : > { %s1493_s0 = smov %s1029_s1  ;;  %s1494_s1 = smov %s1033_s25 }
 0x1ed   : > { %s1495_s25 = smov %s1250_s18  ;;  %s1496_s26 = smov %s1041_s27 }
 0x1ee   : > { %s1497_s27 = smov %s1045_s28  ;;  %s1499_s29 = smov %s1164_s13 }
 0x1ef   :  { %30 = sbr.rel (!%p28_p12) target bundleno = 25 (0x19), region = 103 }
 0x1f1   : > { %s1498_s28 = smov %s1492_s19 }
 0x1f6   :  { %560 = vsyncpa [#allocation6], 1 }
 0x1f7   :  { %562 = vsyncpa [#allocation6 + $0x1], 1 }
 0x1f8   :  { %563 = vsyncpa [#allocation9], 1 }
 0x1f9   :  { %565 = vsyncpa [#allocation9 + $0x1], 1 }
 0x1fa   :  { %566 = vsyncpa [#allocation7], 1 }
 0x1fb   :  { %568 = vsyncpa [#allocation7 + $0x1], 1 }

</bundles_post_ra>
